<compile_context>
chip_gen: v7x
topology: tpu7x:2x2x1
jax: 0.10.0
libtpu: 0.0.40
codegen_flags: <defaults>
</compile_context>

<pallas_src>
import numpy as np
import jax
import jax.numpy as jnp
from jax.experimental import pallas as pl
from jax.experimental.pallas import tpu as pltpu

# Tunables --------------------------------------------------------------------
_TILE_CAP = 512                 # max tile edge; multiple of 128 (lane-dense).
                                # 512 is at/near the HBM roofline on v5e/v6e;
                                # on v7x larger tiles buy a few % but 512 keeps
                                # us safely under every scoped VMEM default.
_BLOCK_BYTES_BUDGET = 2 << 20   # ~2 MiB per block -> ~8 MiB live (in+out, x2 buffers)
_FASTPATH_BYTES = 512 << 10     # below this, pallas_call overhead dominates
_MIN_LANE = 128                 # output last dim below this -> masked stores; bail


def _transpose_last2_kernel(x_ref, o_ref):
    # x_ref block: (bb, ts, td) -> o_ref block: (bb, td, ts).  Pure XLU work,
    # no MXU.  (For packed bf16/int8 inputs pltpu.einshape("bsd->bds", ...)
    # could avoid repack overhead; jnp.transpose is kept for robustness.)
    o_ref[...] = jnp.transpose(x_ref[...], (0, 2, 1))


def _pick_tile(n):
    """Full axis for small/ragged axes (always a legal block dim and cheap),
    fixed _TILE_CAP otherwise; the cdiv grid masks the ragged edge block."""
    return n if n <= _TILE_CAP else _TILE_CAP


def transpose_pallas(x, dim0=1, dim1=2, contiguous=False):
    """Pallas equivalent of Transpose(dim0, dim1)(x).

    The Spectcaster usage -- Transpose(1, 2) on rank-3 (batch, seq, channels)
    tensors -- is lowered to a tiled Pallas kernel; other dim pairs / ranks and
    tiny or lane-sparse inputs fall back to jnp.swapaxes (same semantics).
    """
    nd = x.ndim
    d0, d1 = dim0 % nd, dim1 % nd

    # TODO(synk): only the Spectcaster usage Transpose(1, 2) on rank-3 inputs
    # is lowered to a Pallas kernel; other dim pairs use jnp.swapaxes.
    if nd != 3 or {d0, d1} != {1, 2}:
        return jnp.swapaxes(x, d0, d1)

    B, S, D = x.shape
    itemsize = jnp.dtype(x.dtype).itemsize

    # Fast path: tiny payloads (custom-call overhead dominates) or lane-sparse
    # output last dim (S < 128 -> masked vst.msk partial stores; this is the
    # exact shipped Spectcaster shape, seq=8).
    if (B * S * D * itemsize < _FASTPATH_BYTES) or (S < _MIN_LANE):
        return jnp.swapaxes(x, 1, 2)

    ts = _pick_tile(S)
    td = _pick_tile(D)
    bb = max(1, min(B, _BLOCK_BYTES_BUDGET // (ts * td * itemsize)))

    # S-tile index innermost: consecutive grid steps write output blocks that
    # are adjacent along the output's last (lane) dimension.
    grid = (pl.cdiv(B, bb), pl.cdiv(D, td), pl.cdiv(S, ts))

    out = pl.pallas_call(
        _transpose_last2_kernel,
        out_shape=jax.ShapeDtypeStruct((B, D, S), x.dtype),
        grid=grid,
        in_specs=[pl.BlockSpec((bb, ts, td), lambda b, j, i: (b, i, j))],
        out_specs=pl.BlockSpec((bb, td, ts), lambda b, j, i: (b, j, i)),
        compiler_params=pltpu.CompilerParams(
            dimension_semantics=("parallel", "parallel", "parallel")),
    )(x)
    # `contiguous=True` vs False is a PyTorch memory-layout distinction; the
    # Pallas (and jnp) result is always a fresh contiguous array.
    return out


if __name__ == "__main__":
    # 1) Exact Spectcaster usage: Transpose(1, 2) on (batch, seq, channels).
    #    Tiny input -> small-tensor fast path.
    x = jax.random.normal(jax.random.PRNGKey(0), (2, 8, 32), dtype=jnp.float32)
    out = jax.block_until_ready(transpose_pallas(x, 1, 2, contiguous=True))
    assert out.shape == (2, 32, 8)
    np.testing.assert_array_equal(np.asarray(out),
                                  np.swapaxes(np.asarray(x), 1, 2))

    # 2) Lane-dense Pallas path (single full-array block, bb = 2).
    x2 = jax.random.normal(jax.random.PRNGKey(1), (2, 256, 384), jnp.float32)
    out2 = jax.block_until_ready(transpose_pallas(x2, 1, 2))
    np.testing.assert_array_equal(np.asarray(out2),
                                  np.swapaxes(np.asarray(x2), 1, 2))

    # 3) Ragged axes with fixed 512 tiles + cdiv grid (masked edge blocks).
    x3 = jax.random.normal(jax.random.PRNGKey(2), (1, 520, 640), jnp.float32)
    out3 = jax.block_until_ready(transpose_pallas(x3, 1, 2))
    np.testing.assert_array_equal(np.asarray(out3),
                                  np.swapaxes(np.asarray(x3), 1, 2))

    # 4) Ragged, multi-batch full-axis blocks (bb = 3, non-128-multiple dims).
    x4 = jax.random.normal(jax.random.PRNGKey(3), (3, 200, 260), jnp.float32)
    out4 = jax.block_until_ready(transpose_pallas(x4, 1, 2))
    np.testing.assert_array_equal(np.asarray(out4),
                                  np.swapaxes(np.asarray(x4), 1, 2))

    print("KERNEL_OK")
</pallas_src>

<mosaic_0001>
module attributes {stable_mosaic.version = 11 : i64} {
  func.func @_transpose_last2_kernel(%arg0: i32, %arg1: i32, %arg2: i32, %arg3: memref<2x256x384xf32, #tpu.memory_space<vmem>>, %arg4: memref<2x384x256xf32, #tpu.memory_space<vmem>>) attributes {dimension_semantics = [#tpu.dimension_semantics<parallel>, #tpu.dimension_semantics<parallel>, #tpu.dimension_semantics<parallel>], iteration_bounds = array<i64: 1, 1, 1>, scalar_prefetch = 0 : i64, scratch_operands = 0 : i64, tpu.core_type = #tpu.core_type<tc>, window_params = [{transform_indices = @transform_0, window_bounds = array<i64: 2, 256, 384>}, {transform_indices = @transform_1, window_bounds = array<i64: 2, 384, 256>}]} {
    %c0 = arith.constant 0 : index
    %c0_0 = arith.constant 0 : index
    %c0_1 = arith.constant 0 : index
    %0 = vector.load %arg3[%c0, %c0_0, %c0_1] : memref<2x256x384xf32, #tpu.memory_space<vmem>>, vector<2x256x384xf32>
    %1 = tpu.transpose %0, [0, 2, 1] : vector<2x256x384xf32> -> vector<2x384x256xf32>
    %c0_2 = arith.constant 0 : index
    %c0_3 = arith.constant 0 : index
    %c0_4 = arith.constant 0 : index
    %2 = vector.load %arg4[%c0_2, %c0_3, %c0_4] : memref<2x384x256xf32, #tpu.memory_space<vmem>>, vector<2x384x256xf32>
    tpu.vector_store %arg4[%c0_2, %c0_3, %c0_4], %1 {strides = array<i32>} : memref<2x384x256xf32, #tpu.memory_space<vmem>>, vector<2x384x256xf32>,
    return
  }
  func.func @transform_0(%arg0: i32, %arg1: i32, %arg2: i32) -> (i32, i32, i32) {
    %c0_i32 = arith.constant 0 : i32
    return %arg0, %arg2, %arg1 : i32, i32, i32
  }
  func.func @transform_1(%arg0: i32, %arg1: i32, %arg2: i32) -> (i32, i32, i32) {
    %c0_i32 = arith.constant 0 : i32
    return %arg0, %arg1, %arg2 : i32, i32, i32
  }
}

</mosaic_0001>

<bundles_post_ra>
// kernel: tpu_custom_call.1
= control target key start
LH: loop header
LB: loop body
LE: loop exit
PB: predicated region body
PF: predicated region fallthrough
CT: control target
= control target key end

     0   :  { %6 = vsyncpa [#allocation3], 0  ;;  %s902_s0 = inlined_call_operand.hbm [shape: f32[2,256,384], index: 0, kind: input, shape index: {}]   ;;  %s903_s1 = inlined_call_operand.hbm [shape: f32[2,384,256], index: 1, kind: output, shape index: {}]  }
   0x1   :  { %7 = vsyncpa [#allocation4], 0  ;;  %s862_s6 = smov [#allocation2]   ;;  %s814_s10 = scalar_lea.hbm %s902_s0, 24576 }
   0x2   :  { %s13_s7 = sshll.u32 %s862_s6, 4  ;;  %p815_p0 = scmp.ne.s32.totalorder %s902_s0, %s814_s10  ;;  %s14_s7 = int_to_ptr.vmem [resolvable:$true] %s13_s7 }
   0x3   :  { %p818_p1 = scmp.lt.u32.totalorder %s814_s10, %s902_s0 }
   0x5   :  { %p820_p2 = pnand %p818_p1, %p815_p0 }
   0x7   :  { %823 = shalt.err (!%p820_p2)
}
   0x8   :  { %s824_s15 = scalar_lea.vmem %s14_s7, 24576  ;;  %p829_p4 = scmp.lt.s32.totalorder %s14_s7, %s14_s7 }
   0x9   :  { %p825_p3 = scmp.ne.s32.totalorder %s14_s7, %s824_s15  ;;  %p830_p5 = scmp.lt.s32.totalorder %s824_s15, %s824_s15 }
   0xb   :  { %p831_p6 = por %p830_p5, %p829_p4 }
   0xd   :  { %p832_p7 = pnand %p831_p6, %p825_p3 }
   0xf   :  { %835 = shalt.err (!%p832_p7)
}
  0x10   :  { %s863_s16 = smov 384   ;;  %s864_s17 = smov 24  }
  0x11   :  { %19 = dma.hbm_to_vmem [thread:$0]  %s902_s0, 24576, %s14_s7, [#allocation3], %s863_s16, %s863_s16, %s864_s17  }
  0x12   :  { %858 = dma.done.wait [#allocation3], 24576  }
  0x13   :  { %859 = vsyncadd [#allocation3], 4294942720  ;;  %v24_v0 = vld [vmem:[#allocation2 + $0x8] sm:$0xff]  ;;  %v23_v1 = vld [vmem:[#allocation2] sm:$0xff]  ;;  %s865_s0 = smov [#allocation5]  }
  0x14   :  { %247 = vxpose.xlu1.b32.start [1/16] %v24_v0, 128  ;;  %215 = vxpose.xlu0.b32.start [1/16] %v23_v1, 128  ;;  %v27_v2 = vld [vmem:[#allocation2 + $0x20] sm:$0xff]  ;;  %v26_v3 = vld [vmem:[#allocation2 + $0x18] sm:$0xff]  ;;  %v29_v5 = vld [vmem:[#allocation2 + $0x30] sm:$0xff]  ;;  %s796_s20 = sshll.u32 %s865_s0, 4  ;;  %s797_s20 = int_to_ptr.vmem [resolvable:$true] %s796_s20 }
  0x15   :  { %v30_v4 = vld [vmem:[#allocation2 + $0x38] sm:$0xff]  ;;  %v33_v6 = vld [vmem:[#allocation2 + $0x50] sm:$0xff]  ;;  %v32_v7 = vld [vmem:[#allocation2 + $0x48] sm:$0xff]  ;;  %s836_s21 = scalar_lea.vmem %s797_s20, 24576  ;;  %p841_p9 = scmp.lt.s32.totalorder %s797_s20, %s797_s20 }
  0x16   :  { %v36_v8 = vld [vmem:[#allocation2 + $0x68] sm:$0xff]  ;;  %v35_v9 = vld [vmem:[#allocation2 + $0x60] sm:$0xff]  ;;  %v38_v11 = vld [vmem:[#allocation2 + $0x78] sm:$0xff]  ;;  %p837_p8 = scmp.ne.s32.totalorder %s797_s20, %s836_s21  ;;  %p842_p10 = scmp.lt.s32.totalorder %s836_s21, %s836_s21 }
  0x17   :  { %v39_v10 = vld [vmem:[#allocation2 + $0x80] sm:$0xff]  ;;  %v42_v12 = vld [vmem:[#allocation2 + $0x98] sm:$0xff]  ;;  %v41_v13 = vld [vmem:[#allocation2 + $0x90] sm:$0xff] }
  0x18   :  { %248 = vxpose.xlu1.b32.cont [2/16] %v27_v2, 128  ;;  %216 = vxpose.xlu0.b32.cont [2/16] %v26_v3, 128  ;;  %v45_v14 = vld [vmem:[#allocation2 + $0xb0] sm:$0xff]  ;;  %v44_v15 = vld [vmem:[#allocation2 + $0xa8] sm:$0xff]  ;;  %v47_v17 = vld [vmem:[#allocation2 + $0xc0] sm:$0xff]  ;;  %p843_p11 = por %p842_p10, %p841_p9 }
  0x19   :  { %v48_v16 = vld [vmem:[#allocation2 + $0xc8] sm:$0xff]  ;;  %v51_v18 = vld [vmem:[#allocation2 + $0xe0] sm:$0xff]  ;;  %v50_v19 = vld [vmem:[#allocation2 + $0xd8] sm:$0xff] }
  0x1a   :  { %v54_v20 = vld [vmem:[#allocation2 + $0xf8] sm:$0xff]  ;;  %v53_v21 = vld [vmem:[#allocation2 + $0xf0] sm:$0xff]  ;;  %v56_v23 = vld [vmem:[#allocation2 + $0x108] sm:$0xff]  ;;  %p844_p12 = pnand %p843_p11, %p837_p8 }
  0x1b   :  { %v57_v22 = vld [vmem:[#allocation2 + $0x110] sm:$0xff]  ;;  %v60_v24 = vld [vmem:[#allocation2 + $0x128] sm:$0xff]  ;;  %v59_v25 = vld [vmem:[#allocation2 + $0x120] sm:$0xff] }
  0x1c   :  { %249 = vxpose.xlu1.b32.cont [3/16] %v30_v4, 128  ;;  %217 = vxpose.xlu0.b32.cont [3/16] %v29_v5, 128  ;;  %v63_v26 = vld [vmem:[#allocation2 + $0x140] sm:$0xff]  ;;  %v62_v27 = vld [vmem:[#allocation2 + $0x138] sm:$0xff]  ;;  %v65_v29 = vld [vmem:[#allocation2 + $0x150] sm:$0xff] }
  0x1d   :  { %v66_v28 = vld [vmem:[#allocation2 + $0x158] sm:$0xff]  ;;  %v69_v30 = vld [vmem:[#allocation2 + $0x170] sm:$0xff]  ;;  %v68_v31 = vld [vmem:[#allocation2 + $0x168] sm:$0xff] }
  0x1e   :  { %v71_v32 = vld [vmem:[#allocation2 + $0x180] sm:$0xff]  ;;  %v25_v33 = vld [vmem:[#allocation2 + $0x10] sm:$0xff]  ;;  %v74_v34 = vld [vmem:[#allocation2 + $0x198] sm:$0xff] }
  0x1f   :  { %v28_v35 = vld [vmem:[#allocation2 + $0x28] sm:$0xff]  ;;  %v77_v36 = vld [vmem:[#allocation2 + $0x1b0] sm:$0xff]  ;;  %v31_v37 = vld [vmem:[#allocation2 + $0x40] sm:$0xff] }
  0x20   :  { %250 = vxpose.xlu1.b32.cont [4/16] %v33_v6, 128  ;;  %218 = vxpose.xlu0.b32.cont [4/16] %v32_v7, 128  ;;  %v80_v38 = vld [vmem:[#allocation2 + $0x1c8] sm:$0xff]  ;;  %v34_v39 = vld [vmem:[#allocation2 + $0x58] sm:$0xff]  ;;  %v83_v40 = vld [vmem:[#allocation2 + $0x1e0] sm:$0xff] }
  0x21   :  { %v37_v41 = vld [vmem:[#allocation2 + $0x70] sm:$0xff]  ;;  %v86_v42 = vld [vmem:[#allocation2 + $0x1f8] sm:$0xff]  ;;  %v40_v43 = vld [vmem:[#allocation2 + $0x88] sm:$0xff] }
  0x22   :  { %v89_v44 = vld [vmem:[#allocation2 + $0x210] sm:$0xff]  ;;  %v43_v45 = vld [vmem:[#allocation2 + $0xa0] sm:$0xff]  ;;  %v92_v46 = vld [vmem:[#allocation2 + $0x228] sm:$0xff] }
  0x23   :  { %v46_v47 = vld [vmem:[#allocation2 + $0xb8] sm:$0xff]  ;;  %v95_v48 = vld [vmem:[#allocation2 + $0x240] sm:$0xff]  ;;  %v49_v49 = vld [vmem:[#allocation2 + $0xd0] sm:$0xff] }
  0x24   :  { %251 = vxpose.xlu1.b32.cont [5/16] %v36_v8, 128  ;;  %219 = vxpose.xlu0.b32.cont [5/16] %v35_v9, 128  ;;  %v98_v50 = vld [vmem:[#allocation2 + $0x258] sm:$0xff]  ;;  %v52_v51 = vld [vmem:[#allocation2 + $0xe8] sm:$0xff]  ;;  %v101_v52 = vld [vmem:[#allocation2 + $0x270] sm:$0xff] }
  0x25   :  { %v55_v53 = vld [vmem:[#allocation2 + $0x100] sm:$0xff]  ;;  %v104_v54 = vld [vmem:[#allocation2 + $0x288] sm:$0xff]  ;;  %v58_v55 = vld [vmem:[#allocation2 + $0x118] sm:$0xff] }
  0x26   :  { %v107_v56 = vld [vmem:[#allocation2 + $0x2a0] sm:$0xff]  ;;  %v61_v57 = vld [vmem:[#allocation2 + $0x130] sm:$0xff]  ;;  %v110_v58 = vld [vmem:[#allocation2 + $0x2b8] sm:$0xff] }
  0x27   :  { %v64_v59 = vld [vmem:[#allocation2 + $0x148] sm:$0xff]  ;;  %v113_v60 = vld [vmem:[#allocation2 + $0x2d0] sm:$0xff]  ;;  %v67_v61 = vld [vmem:[#allocation2 + $0x160] sm:$0xff] }
  0x28   :  { %252 = vxpose.xlu1.b32.cont [6/16] %v39_v10, 128  ;;  %220 = vxpose.xlu0.b32.cont [6/16] %v38_v11, 128  ;;  %v116_v62 = vld [vmem:[#allocation2 + $0x2e8] sm:$0xff]  ;;  %v70_v63 = vld [vmem:[#allocation2 + $0x178] sm:$0xff]  ;;  %v73_v0 = vld [vmem:[#allocation2 + $0x190] sm:$0xff] }
  0x29   :  { %v72_v1 = vld [vmem:[#allocation2 + $0x188] sm:$0xff]  ;;  %v75_v5 = vld [vmem:[#allocation2 + $0x1a0] sm:$0xff]  ;;  %v78_v9 = vld [vmem:[#allocation2 + $0x1b8] sm:$0xff] }
  0x2a   :  { %v76_v4 = vld [vmem:[#allocation2 + $0x1a8] sm:$0xff]  ;;  %v79_v8 = vld [vmem:[#allocation2 + $0x1c0] sm:$0xff] }
  0x2c   :  { %253 = vxpose.xlu1.b32.cont [7/16] %v42_v12, 128  ;;  %221 = vxpose.xlu0.b32.cont [7/16] %v41_v13, 128  ;;  %v82_v12 = vld [vmem:[#allocation2 + $0x1d8] sm:$0xff]  ;;  %v81_v13 = vld [vmem:[#allocation2 + $0x1d0] sm:$0xff] }
  0x30   :  { %254 = vxpose.xlu1.b32.cont [8/16] %v45_v14, 128  ;;  %222 = vxpose.xlu0.b32.cont [8/16] %v44_v15, 128 }
  0x34   :  { %255 = vxpose.xlu1.b32.cont [9/16] %v48_v16, 128  ;;  %223 = vxpose.xlu0.b32.cont [9/16] %v47_v17, 128  ;;  %v85_v16 = vld [vmem:[#allocation2 + $0x1f0] sm:$0xff]  ;;  %v84_v17 = vld [vmem:[#allocation2 + $0x1e8] sm:$0xff] }
  0x38   :  { %256 = vxpose.xlu1.b32.cont [10/16] %v51_v18, 128  ;;  %224 = vxpose.xlu0.b32.cont [10/16] %v50_v19, 128 }
  0x3c   :  { %257 = vxpose.xlu1.b32.cont [11/16] %v54_v20, 128  ;;  %225 = vxpose.xlu0.b32.cont [11/16] %v53_v21, 128  ;;  %v88_v20 = vld [vmem:[#allocation2 + $0x208] sm:$0xff]  ;;  %v87_v21 = vld [vmem:[#allocation2 + $0x200] sm:$0xff] }
  0x40   :  { %258 = vxpose.xlu1.b32.cont [12/16] %v57_v22, 128  ;;  %226 = vxpose.xlu0.b32.cont [12/16] %v56_v23, 128 }
  0x44   :  { %259 = vxpose.xlu1.b32.cont [13/16] %v60_v24, 128  ;;  %227 = vxpose.xlu0.b32.cont [13/16] %v59_v25, 128  ;;  %v91_v24 = vld [vmem:[#allocation2 + $0x220] sm:$0xff]  ;;  %v90_v25 = vld [vmem:[#allocation2 + $0x218] sm:$0xff] }
  0x48   :  { %260 = vxpose.xlu1.b32.cont [14/16] %v63_v26, 128  ;;  %228 = vxpose.xlu0.b32.cont [14/16] %v62_v27, 128 }
  0x4c   :  { %261 = vxpose.xlu1.b32.cont [15/16] %v66_v28, 128  ;;  %229 = vxpose.xlu0.b32.cont [15/16] %v65_v29, 128  ;;  %v94_v28 = vld [vmem:[#allocation2 + $0x238] sm:$0xff]  ;;  %v93_v29 = vld [vmem:[#allocation2 + $0x230] sm:$0xff] }
  0x50   :  { %262 = vxpose.xlu1.b32.end [16/16] %v69_v30, 128  ;;  %230 = vxpose.xlu0.b32.end [16/16] %v68_v31, 128 }
  0x54   :  { %311 = vxpose.xlu1.b32.start [1/16] %v71_v32, 128  ;;  %279 = vxpose.xlu0.b32.start [1/16] %v25_v33, 128  ;;  %v97_v32 = vld [vmem:[#allocation2 + $0x250] sm:$0xff]  ;;  %v96_v33 = vld [vmem:[#allocation2 + $0x248] sm:$0xff] }
  0x58   :  { %312 = vxpose.xlu1.b32.cont [2/16] %v74_v34, 128  ;;  %280 = vxpose.xlu0.b32.cont [2/16] %v28_v35, 128 }
  0x5c   :  { %313 = vxpose.xlu1.b32.cont [3/16] %v77_v36, 128  ;;  %281 = vxpose.xlu0.b32.cont [3/16] %v31_v37, 128  ;;  %v100_v36 = vld [vmem:[#allocation2 + $0x268] sm:$0xff]  ;;  %v99_v37 = vld [vmem:[#allocation2 + $0x260] sm:$0xff] }
  0x60   :  { %314 = vxpose.xlu1.b32.cont [4/16] %v80_v38, 128  ;;  %282 = vxpose.xlu0.b32.cont [4/16] %v34_v39, 128 }
  0x64   :  { %315 = vxpose.xlu1.b32.cont [5/16] %v83_v40, 128  ;;  %283 = vxpose.xlu0.b32.cont [5/16] %v37_v41, 128  ;;  %v103_v40 = vld [vmem:[#allocation2 + $0x280] sm:$0xff]  ;;  %v102_v41 = vld [vmem:[#allocation2 + $0x278] sm:$0xff] }
  0x68   :  { %316 = vxpose.xlu1.b32.cont [6/16] %v86_v42, 128  ;;  %284 = vxpose.xlu0.b32.cont [6/16] %v40_v43, 128 }
  0x6c   :  { %317 = vxpose.xlu1.b32.cont [7/16] %v89_v44, 128  ;;  %285 = vxpose.xlu0.b32.cont [7/16] %v43_v45, 128  ;;  %v106_v44 = vld [vmem:[#allocation2 + $0x298] sm:$0xff]  ;;  %v105_v45 = vld [vmem:[#allocation2 + $0x290] sm:$0xff] }
  0x70   :  { %318 = vxpose.xlu1.b32.cont [8/16] %v92_v46, 128  ;;  %286 = vxpose.xlu0.b32.cont [8/16] %v46_v47, 128 }
  0x74   :  { %319 = vxpose.xlu1.b32.cont [9/16] %v95_v48, 128  ;;  %287 = vxpose.xlu0.b32.cont [9/16] %v49_v49, 128  ;;  %v109_v48 = vld [vmem:[#allocation2 + $0x2b0] sm:$0xff]  ;;  %v108_v49 = vld [vmem:[#allocation2 + $0x2a8] sm:$0xff] }
  0x78   :  { %320 = vxpose.xlu1.b32.cont [10/16] %v98_v50, 128  ;;  %288 = vxpose.xlu0.b32.cont [10/16] %v52_v51, 128 }
  0x7c   :  { %321 = vxpose.xlu1.b32.cont [11/16] %v101_v52, 128  ;;  %289 = vxpose.xlu0.b32.cont [11/16] %v55_v53, 128  ;;  %v112_v52 = vld [vmem:[#allocation2 + $0x2c8] sm:$0xff]  ;;  %v111_v53 = vld [vmem:[#allocation2 + $0x2c0] sm:$0xff] }
  0x80   :  { %322 = vxpose.xlu1.b32.cont [12/16] %v104_v54, 128  ;;  %290 = vxpose.xlu0.b32.cont [12/16] %v58_v55, 128 }
  0x84   :  { %323 = vxpose.xlu1.b32.cont [13/16] %v107_v56, 128  ;;  %291 = vxpose.xlu0.b32.cont [13/16] %v61_v57, 128  ;;  %v115_v56 = vld [vmem:[#allocation2 + $0x2e0] sm:$0xff]  ;;  %v114_v57 = vld [vmem:[#allocation2 + $0x2d8] sm:$0xff] }
  0x88   :  { %324 = vxpose.xlu1.b32.cont [14/16] %v110_v58, 128  ;;  %292 = vxpose.xlu0.b32.cont [14/16] %v64_v59, 128 }
  0x8c   :  { %325 = vxpose.xlu1.b32.cont [15/16] %v113_v60, 128  ;;  %293 = vxpose.xlu0.b32.cont [15/16] %v67_v61, 128  ;;  %v118_v60 = vld [vmem:[#allocation2 + $0x2f8] sm:$0xff]  ;;  %v117_v61 = vld [vmem:[#allocation2 + $0x2f0] sm:$0xff] }
  0x90   :  { %326 = vxpose.xlu1.b32.end [16/16] %v116_v62, 128  ;;  %294 = vxpose.xlu0.b32.end [16/16] %v70_v63, 128 }
  0x94   :  { %375 = vxpose.xlu1.b32.start [1/16] %v73_v0, 128  ;;  %v263_v2 = vpop.trf.xlu1  ;;  %343 = vxpose.xlu0.b32.start [1/16] %v72_v1, 128  ;;  %v231_v3 = vpop.trf.xlu0  ;;  %v120_v0 = vld [vmem:[#allocation2 + $0x308] sm:$0xff]  ;;  %v119_v1 = vld [vmem:[#allocation2 + $0x300] sm:$0xff] }
  0x95   :  { %631 = vst [vmem:[#allocation5 + $0x100] sm:$0xff] %v263_v2  ;;  %599 = vst [vmem:[#allocation5] sm:$0xff] %v231_v3 }
  0x98   :  { %376 = vxpose.xlu1.b32.cont [2/16] %v76_v4, 128  ;;  %v264_v6 = vpop.trf.xlu1  ;;  %344 = vxpose.xlu0.b32.cont [2/16] %v75_v5, 128  ;;  %v232_v7 = vpop.trf.xlu0  ;;  %v123_v4 = vld [vmem:[#allocation2 + $0x320] sm:$0xff]  ;;  %v122_v5 = vld [vmem:[#allocation2 + $0x318] sm:$0xff] }
  0x99   :  { %633 = vst [vmem:[#allocation5 + $0x110] sm:$0xff] %v264_v6  ;;  %601 = vst [vmem:[#allocation5 + $0x10] sm:$0xff] %v232_v7 }
  0x9c   :  { %377 = vxpose.xlu1.b32.cont [3/16] %v79_v8, 128  ;;  %v265_v10 = vpop.trf.xlu1  ;;  %345 = vxpose.xlu0.b32.cont [3/16] %v78_v9, 128  ;;  %v233_v11 = vpop.trf.xlu0  ;;  %v126_v8 = vld [vmem:[#allocation2 + $0x338] sm:$0xff]  ;;  %v125_v9 = vld [vmem:[#allocation2 + $0x330] sm:$0xff] }
  0x9d   :  { %635 = vst [vmem:[#allocation5 + $0x120] sm:$0xff] %v265_v10  ;;  %603 = vst [vmem:[#allocation5 + $0x20] sm:$0xff] %v233_v11 }
  0xa0   :  { %378 = vxpose.xlu1.b32.cont [4/16] %v82_v12, 128  ;;  %v266_v14 = vpop.trf.xlu1  ;;  %346 = vxpose.xlu0.b32.cont [4/16] %v81_v13, 128  ;;  %v234_v15 = vpop.trf.xlu0  ;;  %v129_v12 = vld [vmem:[#allocation2 + $0x350] sm:$0xff]  ;;  %v128_v13 = vld [vmem:[#allocation2 + $0x348] sm:$0xff] }
  0xa1   :  { %637 = vst [vmem:[#allocation5 + $0x130] sm:$0xff] %v266_v14  ;;  %605 = vst [vmem:[#allocation5 + $0x30] sm:$0xff] %v234_v15 }
  0xa4   :  { %379 = vxpose.xlu1.b32.cont [5/16] %v85_v16, 128  ;;  %v267_v18 = vpop.trf.xlu1  ;;  %347 = vxpose.xlu0.b32.cont [5/16] %v84_v17, 128  ;;  %v235_v19 = vpop.trf.xlu0  ;;  %v132_v16 = vld [vmem:[#allocation2 + $0x368] sm:$0xff]  ;;  %v131_v17 = vld [vmem:[#allocation2 + $0x360] sm:$0xff] }
  0xa5   :  { %639 = vst [vmem:[#allocation5 + $0x140] sm:$0xff] %v267_v18  ;;  %607 = vst [vmem:[#allocation5 + $0x40] sm:$0xff] %v235_v19 }
  0xa8   :  { %380 = vxpose.xlu1.b32.cont [6/16] %v88_v20, 128  ;;  %v268_v22 = vpop.trf.xlu1  ;;  %348 = vxpose.xlu0.b32.cont [6/16] %v87_v21, 128  ;;  %v236_v23 = vpop.trf.xlu0  ;;  %v135_v20 = vld [vmem:[#allocation2 + $0x380] sm:$0xff]  ;;  %v134_v21 = vld [vmem:[#allocation2 + $0x378] sm:$0xff] }
  0xa9   :  { %641 = vst [vmem:[#allocation5 + $0x150] sm:$0xff] %v268_v22  ;;  %609 = vst [vmem:[#allocation5 + $0x50] sm:$0xff] %v236_v23 }
  0xac   :  { %381 = vxpose.xlu1.b32.cont [7/16] %v91_v24, 128  ;;  %v269_v26 = vpop.trf.xlu1  ;;  %349 = vxpose.xlu0.b32.cont [7/16] %v90_v25, 128  ;;  %v237_v27 = vpop.trf.xlu0  ;;  %v138_v24 = vld [vmem:[#allocation2 + $0x398] sm:$0xff]  ;;  %v137_v25 = vld [vmem:[#allocation2 + $0x390] sm:$0xff] }
  0xad   :  { %643 = vst [vmem:[#allocation5 + $0x160] sm:$0xff] %v269_v26  ;;  %611 = vst [vmem:[#allocation5 + $0x60] sm:$0xff] %v237_v27 }
  0xb0   :  { %382 = vxpose.xlu1.b32.cont [8/16] %v94_v28, 128  ;;  %v270_v30 = vpop.trf.xlu1  ;;  %350 = vxpose.xlu0.b32.cont [8/16] %v93_v29, 128  ;;  %v238_v31 = vpop.trf.xlu0  ;;  %v141_v28 = vld [vmem:[#allocation2 + $0x3b0] sm:$0xff]  ;;  %v140_v29 = vld [vmem:[#allocation2 + $0x3a8] sm:$0xff] }
  0xb1   :  { %645 = vst [vmem:[#allocation5 + $0x170] sm:$0xff] %v270_v30  ;;  %613 = vst [vmem:[#allocation5 + $0x70] sm:$0xff] %v238_v31 }
  0xb4   :  { %383 = vxpose.xlu1.b32.cont [9/16] %v97_v32, 128  ;;  %v271_v34 = vpop.trf.xlu1  ;;  %351 = vxpose.xlu0.b32.cont [9/16] %v96_v33, 128  ;;  %v239_v35 = vpop.trf.xlu0  ;;  %v144_v32 = vld [vmem:[#allocation2 + $0x3c8] sm:$0xff]  ;;  %v143_v33 = vld [vmem:[#allocation2 + $0x3c0] sm:$0xff] }
  0xb5   :  { %647 = vst [vmem:[#allocation5 + $0x180] sm:$0xff] %v271_v34  ;;  %615 = vst [vmem:[#allocation5 + $0x80] sm:$0xff] %v239_v35 }
  0xb8   :  { %384 = vxpose.xlu1.b32.cont [10/16] %v100_v36, 128  ;;  %v272_v38 = vpop.trf.xlu1  ;;  %352 = vxpose.xlu0.b32.cont [10/16] %v99_v37, 128  ;;  %v240_v39 = vpop.trf.xlu0  ;;  %v147_v36 = vld [vmem:[#allocation2 + $0x3e0] sm:$0xff]  ;;  %v146_v37 = vld [vmem:[#allocation2 + $0x3d8] sm:$0xff] }
  0xb9   :  { %649 = vst [vmem:[#allocation5 + $0x190] sm:$0xff] %v272_v38  ;;  %617 = vst [vmem:[#allocation5 + $0x90] sm:$0xff] %v240_v39 }
  0xbc   :  { %385 = vxpose.xlu1.b32.cont [11/16] %v103_v40, 128  ;;  %v273_v42 = vpop.trf.xlu1  ;;  %353 = vxpose.xlu0.b32.cont [11/16] %v102_v41, 128  ;;  %v241_v43 = vpop.trf.xlu0  ;;  %v150_v40 = vld [vmem:[#allocation2 + $0x3f8] sm:$0xff]  ;;  %v149_v41 = vld [vmem:[#allocation2 + $0x3f0] sm:$0xff] }
  0xbd   :  { %651 = vst [vmem:[#allocation5 + $0x1a0] sm:$0xff] %v273_v42  ;;  %619 = vst [vmem:[#allocation5 + $0xa0] sm:$0xff] %v241_v43 }
  0xc0   :  { %386 = vxpose.xlu1.b32.cont [12/16] %v106_v44, 128  ;;  %v274_v46 = vpop.trf.xlu1  ;;  %354 = vxpose.xlu0.b32.cont [12/16] %v105_v45, 128  ;;  %v242_v47 = vpop.trf.xlu0  ;;  %v153_v44 = vld [vmem:[#allocation2 + $0x410] sm:$0xff]  ;;  %v152_v45 = vld [vmem:[#allocation2 + $0x408] sm:$0xff] }
  0xc1   :  { %653 = vst [vmem:[#allocation5 + $0x1b0] sm:$0xff] %v274_v46  ;;  %621 = vst [vmem:[#allocation5 + $0xb0] sm:$0xff] %v242_v47 }
  0xc4   :  { %387 = vxpose.xlu1.b32.cont [13/16] %v109_v48, 128  ;;  %v275_v50 = vpop.trf.xlu1  ;;  %355 = vxpose.xlu0.b32.cont [13/16] %v108_v49, 128  ;;  %v243_v51 = vpop.trf.xlu0  ;;  %v156_v48 = vld [vmem:[#allocation2 + $0x428] sm:$0xff]  ;;  %v155_v49 = vld [vmem:[#allocation2 + $0x420] sm:$0xff] }
  0xc5   :  { %655 = vst [vmem:[#allocation5 + $0x1c0] sm:$0xff] %v275_v50  ;;  %623 = vst [vmem:[#allocation5 + $0xc0] sm:$0xff] %v243_v51 }
  0xc8   :  { %388 = vxpose.xlu1.b32.cont [14/16] %v112_v52, 128  ;;  %v276_v54 = vpop.trf.xlu1  ;;  %356 = vxpose.xlu0.b32.cont [14/16] %v111_v53, 128  ;;  %v244_v55 = vpop.trf.xlu0  ;;  %v159_v52 = vld [vmem:[#allocation2 + $0x440] sm:$0xff]  ;;  %v158_v53 = vld [vmem:[#allocation2 + $0x438] sm:$0xff] }
  0xc9   :  { %657 = vst [vmem:[#allocation5 + $0x1d0] sm:$0xff] %v276_v54  ;;  %625 = vst [vmem:[#allocation5 + $0xd0] sm:$0xff] %v244_v55 }
  0xcc   :  { %389 = vxpose.xlu1.b32.cont [15/16] %v115_v56, 128  ;;  %v277_v58 = vpop.trf.xlu1  ;;  %357 = vxpose.xlu0.b32.cont [15/16] %v114_v57, 128  ;;  %v245_v59 = vpop.trf.xlu0  ;;  %v162_v56 = vld [vmem:[#allocation2 + $0x458] sm:$0xff]  ;;  %v161_v57 = vld [vmem:[#allocation2 + $0x450] sm:$0xff] }
  0xcd   :  { %659 = vst [vmem:[#allocation5 + $0x1e0] sm:$0xff] %v277_v58  ;;  %627 = vst [vmem:[#allocation5 + $0xe0] sm:$0xff] %v245_v59 }
  0xd0   :  { %390 = vxpose.xlu1.b32.end [16/16] %v118_v60, 128  ;;  %v278_v62 = vpop.trf.xlu1  ;;  %358 = vxpose.xlu0.b32.end [16/16] %v117_v61, 128  ;;  %v246_v63 = vpop.trf.xlu0  ;;  %v165_v60 = vld [vmem:[#allocation2 + $0x470] sm:$0xff]  ;;  %v164_v61 = vld [vmem:[#allocation2 + $0x468] sm:$0xff] }
  0xd1   :  { %661 = vst [vmem:[#allocation5 + $0x1f0] sm:$0xff] %v278_v62  ;;  %629 = vst [vmem:[#allocation5 + $0xf0] sm:$0xff] %v246_v63 }
  0xd4   :  { %439 = vxpose.xlu1.b32.start [1/16] %v120_v0, 128  ;;  %v327_v2 = vpop.trf.xlu1  ;;  %407 = vxpose.xlu0.b32.start [1/16] %v119_v1, 128  ;;  %v295_v3 = vpop.trf.xlu0  ;;  %v167_v0 = vld [vmem:[#allocation2 + $0x480] sm:$0xff]  ;;  %v121_v1 = vld [vmem:[#allocation2 + $0x310] sm:$0xff] }
  0xd5   :  { %600 = vst [vmem:[#allocation5 + $0x8] sm:$0xff] %v327_v2  ;;  %663 = vst [vmem:[#allocation5 + $0x200] sm:$0xff] %v295_v3 }
  0xd8   :  { %440 = vxpose.xlu1.b32.cont [2/16] %v123_v4, 128  ;;  %v328_v6 = vpop.trf.xlu1  ;;  %408 = vxpose.xlu0.b32.cont [2/16] %v122_v5, 128  ;;  %v296_v7 = vpop.trf.xlu0  ;;  %v170_v4 = vld [vmem:[#allocation2 + $0x498] sm:$0xff]  ;;  %v124_v5 = vld [vmem:[#allocation2 + $0x328] sm:$0xff] }
  0xd9   :  { %602 = vst [vmem:[#allocation5 + $0x18] sm:$0xff] %v328_v6  ;;  %665 = vst [vmem:[#allocation5 + $0x210] sm:$0xff] %v296_v7 }
  0xdc   :  { %441 = vxpose.xlu1.b32.cont [3/16] %v126_v8, 128  ;;  %v329_v10 = vpop.trf.xlu1  ;;  %409 = vxpose.xlu0.b32.cont [3/16] %v125_v9, 128  ;;  %v297_v11 = vpop.trf.xlu0  ;;  %v173_v8 = vld [vmem:[#allocation2 + $0x4b0] sm:$0xff]  ;;  %v127_v9 = vld [vmem:[#allocation2 + $0x340] sm:$0xff] }
  0xdd   :  { %604 = vst [vmem:[#allocation5 + $0x28] sm:$0xff] %v329_v10  ;;  %667 = vst [vmem:[#allocation5 + $0x220] sm:$0xff] %v297_v11 }
  0xe0   :  { %442 = vxpose.xlu1.b32.cont [4/16] %v129_v12, 128  ;;  %v330_v14 = vpop.trf.xlu1  ;;  %410 = vxpose.xlu0.b32.cont [4/16] %v128_v13, 128  ;;  %v298_v15 = vpop.trf.xlu0  ;;  %v176_v12 = vld [vmem:[#allocation2 + $0x4c8] sm:$0xff]  ;;  %v130_v13 = vld [vmem:[#allocation2 + $0x358] sm:$0xff] }
  0xe1   :  { %606 = vst [vmem:[#allocation5 + $0x38] sm:$0xff] %v330_v14  ;;  %669 = vst [vmem:[#allocation5 + $0x230] sm:$0xff] %v298_v15 }
  0xe4   :  { %443 = vxpose.xlu1.b32.cont [5/16] %v132_v16, 128  ;;  %v331_v18 = vpop.trf.xlu1  ;;  %411 = vxpose.xlu0.b32.cont [5/16] %v131_v17, 128  ;;  %v299_v19 = vpop.trf.xlu0  ;;  %v179_v16 = vld [vmem:[#allocation2 + $0x4e0] sm:$0xff]  ;;  %v133_v17 = vld [vmem:[#allocation2 + $0x370] sm:$0xff] }
  0xe5   :  { %608 = vst [vmem:[#allocation5 + $0x48] sm:$0xff] %v331_v18  ;;  %671 = vst [vmem:[#allocation5 + $0x240] sm:$0xff] %v299_v19 }
  0xe8   :  { %444 = vxpose.xlu1.b32.cont [6/16] %v135_v20, 128  ;;  %v332_v22 = vpop.trf.xlu1  ;;  %412 = vxpose.xlu0.b32.cont [6/16] %v134_v21, 128  ;;  %v300_v23 = vpop.trf.xlu0  ;;  %v182_v20 = vld [vmem:[#allocation2 + $0x4f8] sm:$0xff]  ;;  %v136_v21 = vld [vmem:[#allocation2 + $0x388] sm:$0xff] }
  0xe9   :  { %610 = vst [vmem:[#allocation5 + $0x58] sm:$0xff] %v332_v22  ;;  %673 = vst [vmem:[#allocation5 + $0x250] sm:$0xff] %v300_v23 }
  0xec   :  { %445 = vxpose.xlu1.b32.cont [7/16] %v138_v24, 128  ;;  %v333_v26 = vpop.trf.xlu1  ;;  %413 = vxpose.xlu0.b32.cont [7/16] %v137_v25, 128  ;;  %v301_v27 = vpop.trf.xlu0  ;;  %v185_v24 = vld [vmem:[#allocation2 + $0x510] sm:$0xff]  ;;  %v139_v25 = vld [vmem:[#allocation2 + $0x3a0] sm:$0xff] }
  0xed   :  { %612 = vst [vmem:[#allocation5 + $0x68] sm:$0xff] %v333_v26  ;;  %675 = vst [vmem:[#allocation5 + $0x260] sm:$0xff] %v301_v27 }
  0xf0   :  { %446 = vxpose.xlu1.b32.cont [8/16] %v141_v28, 128  ;;  %v334_v30 = vpop.trf.xlu1  ;;  %414 = vxpose.xlu0.b32.cont [8/16] %v140_v29, 128  ;;  %v302_v31 = vpop.trf.xlu0  ;;  %v188_v28 = vld [vmem:[#allocation2 + $0x528] sm:$0xff]  ;;  %v142_v29 = vld [vmem:[#allocation2 + $0x3b8] sm:$0xff] }
  0xf1   :  { %614 = vst [vmem:[#allocation5 + $0x78] sm:$0xff] %v334_v30  ;;  %677 = vst [vmem:[#allocation5 + $0x270] sm:$0xff] %v302_v31 }
  0xf4   :  { %447 = vxpose.xlu1.b32.cont [9/16] %v144_v32, 128  ;;  %v335_v34 = vpop.trf.xlu1  ;;  %415 = vxpose.xlu0.b32.cont [9/16] %v143_v33, 128  ;;  %v303_v35 = vpop.trf.xlu0  ;;  %v191_v32 = vld [vmem:[#allocation2 + $0x540] sm:$0xff]  ;;  %v145_v33 = vld [vmem:[#allocation2 + $0x3d0] sm:$0xff] }
  0xf5   :  { %616 = vst [vmem:[#allocation5 + $0x88] sm:$0xff] %v335_v34  ;;  %679 = vst [vmem:[#allocation5 + $0x280] sm:$0xff] %v303_v35 }
  0xf8   :  { %448 = vxpose.xlu1.b32.cont [10/16] %v147_v36, 128  ;;  %v336_v38 = vpop.trf.xlu1  ;;  %416 = vxpose.xlu0.b32.cont [10/16] %v146_v37, 128  ;;  %v304_v39 = vpop.trf.xlu0  ;;  %v194_v36 = vld [vmem:[#allocation2 + $0x558] sm:$0xff]  ;;  %v148_v37 = vld [vmem:[#allocation2 + $0x3e8] sm:$0xff] }
  0xf9   :  { %618 = vst [vmem:[#allocation5 + $0x98] sm:$0xff] %v336_v38  ;;  %681 = vst [vmem:[#allocation5 + $0x290] sm:$0xff] %v304_v39 }
  0xfc   :  { %449 = vxpose.xlu1.b32.cont [11/16] %v150_v40, 128  ;;  %v337_v42 = vpop.trf.xlu1  ;;  %417 = vxpose.xlu0.b32.cont [11/16] %v149_v41, 128  ;;  %v305_v43 = vpop.trf.xlu0  ;;  %v197_v40 = vld [vmem:[#allocation2 + $0x570] sm:$0xff]  ;;  %v151_v41 = vld [vmem:[#allocation2 + $0x400] sm:$0xff] }
  0xfd   :  { %620 = vst [vmem:[#allocation5 + $0xa8] sm:$0xff] %v337_v42  ;;  %683 = vst [vmem:[#allocation5 + $0x2a0] sm:$0xff] %v305_v43 }
 0x100   :  { %450 = vxpose.xlu1.b32.cont [12/16] %v153_v44, 128  ;;  %v338_v46 = vpop.trf.xlu1  ;;  %418 = vxpose.xlu0.b32.cont [12/16] %v152_v45, 128  ;;  %v306_v47 = vpop.trf.xlu0  ;;  %v200_v44 = vld [vmem:[#allocation2 + $0x588] sm:$0xff]  ;;  %v154_v45 = vld [vmem:[#allocation2 + $0x418] sm:$0xff] }
 0x101   :  { %622 = vst [vmem:[#allocation5 + $0xb8] sm:$0xff] %v338_v46  ;;  %685 = vst [vmem:[#allocation5 + $0x2b0] sm:$0xff] %v306_v47 }
 0x104   :  { %451 = vxpose.xlu1.b32.cont [13/16] %v156_v48, 128  ;;  %v339_v50 = vpop.trf.xlu1  ;;  %419 = vxpose.xlu0.b32.cont [13/16] %v155_v49, 128  ;;  %v307_v51 = vpop.trf.xlu0  ;;  %v203_v48 = vld [vmem:[#allocation2 + $0x5a0] sm:$0xff]  ;;  %v157_v49 = vld [vmem:[#allocation2 + $0x430] sm:$0xff] }
 0x105   :  { %624 = vst [vmem:[#allocation5 + $0xc8] sm:$0xff] %v339_v50  ;;  %687 = vst [vmem:[#allocation5 + $0x2c0] sm:$0xff] %v307_v51 }
 0x108   :  { %452 = vxpose.xlu1.b32.cont [14/16] %v159_v52, 128  ;;  %v340_v54 = vpop.trf.xlu1  ;;  %420 = vxpose.xlu0.b32.cont [14/16] %v158_v53, 128  ;;  %v308_v55 = vpop.trf.xlu0  ;;  %v206_v52 = vld [vmem:[#allocation2 + $0x5b8] sm:$0xff]  ;;  %v160_v53 = vld [vmem:[#allocation2 + $0x448] sm:$0xff] }
 0x109   :  { %626 = vst [vmem:[#allocation5 + $0xd8] sm:$0xff] %v340_v54  ;;  %689 = vst [vmem:[#allocation5 + $0x2d0] sm:$0xff] %v308_v55 }
 0x10c   :  { %453 = vxpose.xlu1.b32.cont [15/16] %v162_v56, 128  ;;  %v341_v58 = vpop.trf.xlu1  ;;  %421 = vxpose.xlu0.b32.cont [15/16] %v161_v57, 128  ;;  %v309_v59 = vpop.trf.xlu0  ;;  %v209_v56 = vld [vmem:[#allocation2 + $0x5d0] sm:$0xff]  ;;  %v163_v57 = vld [vmem:[#allocation2 + $0x460] sm:$0xff] }
 0x10d   :  { %628 = vst [vmem:[#allocation5 + $0xe8] sm:$0xff] %v341_v58  ;;  %691 = vst [vmem:[#allocation5 + $0x2e0] sm:$0xff] %v309_v59 }
 0x110   :  { %454 = vxpose.xlu1.b32.end [16/16] %v165_v60, 128  ;;  %v342_v62 = vpop.trf.xlu1  ;;  %422 = vxpose.xlu0.b32.end [16/16] %v164_v61, 128  ;;  %v310_v63 = vpop.trf.xlu0  ;;  %v212_v60 = vld [vmem:[#allocation2 + $0x5e8] sm:$0xff]  ;;  %v166_v61 = vld [vmem:[#allocation2 + $0x478] sm:$0xff] }
 0x111   :  { %630 = vst [vmem:[#allocation5 + $0xf8] sm:$0xff] %v342_v62  ;;  %693 = vst [vmem:[#allocation5 + $0x2f0] sm:$0xff] %v310_v63 }
 0x114   :  { %503 = vxpose.xlu1.b32.start [1/16] %v167_v0, 128  ;;  %v391_v2 = vpop.trf.xlu1  ;;  %471 = vxpose.xlu0.b32.start [1/16] %v121_v1, 128  ;;  %v359_v3 = vpop.trf.xlu0  ;;  %v169_v0 = vld [vmem:[#allocation2 + $0x490] sm:$0xff]  ;;  %v168_v1 = vld [vmem:[#allocation2 + $0x488] sm:$0xff] }
 0x115   :  { %664 = vst [vmem:[#allocation5 + $0x208] sm:$0xff] %v391_v2  ;;  %632 = vst [vmem:[#allocation5 + $0x108] sm:$0xff] %v359_v3 }
 0x118   :  { %504 = vxpose.xlu1.b32.cont [2/16] %v170_v4, 128  ;;  %v392_v6 = vpop.trf.xlu1  ;;  %472 = vxpose.xlu0.b32.cont [2/16] %v124_v5, 128  ;;  %v360_v7 = vpop.trf.xlu0  ;;  %v172_v4 = vld [vmem:[#allocation2 + $0x4a8] sm:$0xff]  ;;  %v171_v5 = vld [vmem:[#allocation2 + $0x4a0] sm:$0xff] }
 0x119   :  { %666 = vst [vmem:[#allocation5 + $0x218] sm:$0xff] %v392_v6  ;;  %634 = vst [vmem:[#allocation5 + $0x118] sm:$0xff] %v360_v7 }
 0x11c   :  { %505 = vxpose.xlu1.b32.cont [3/16] %v173_v8, 128  ;;  %v393_v10 = vpop.trf.xlu1  ;;  %473 = vxpose.xlu0.b32.cont [3/16] %v127_v9, 128  ;;  %v361_v11 = vpop.trf.xlu0  ;;  %v175_v8 = vld [vmem:[#allocation2 + $0x4c0] sm:$0xff]  ;;  %v174_v9 = vld [vmem:[#allocation2 + $0x4b8] sm:$0xff] }
 0x11d   :  { %668 = vst [vmem:[#allocation5 + $0x228] sm:$0xff] %v393_v10  ;;  %636 = vst [vmem:[#allocation5 + $0x128] sm:$0xff] %v361_v11 }
 0x120   :  { %506 = vxpose.xlu1.b32.cont [4/16] %v176_v12, 128  ;;  %v394_v14 = vpop.trf.xlu1  ;;  %474 = vxpose.xlu0.b32.cont [4/16] %v130_v13, 128  ;;  %v362_v15 = vpop.trf.xlu0  ;;  %v178_v12 = vld [vmem:[#allocation2 + $0x4d8] sm:$0xff]  ;;  %v177_v13 = vld [vmem:[#allocation2 + $0x4d0] sm:$0xff] }
 0x121   :  { %670 = vst [vmem:[#allocation5 + $0x238] sm:$0xff] %v394_v14  ;;  %638 = vst [vmem:[#allocation5 + $0x138] sm:$0xff] %v362_v15 }
 0x124   :  { %507 = vxpose.xlu1.b32.cont [5/16] %v179_v16, 128  ;;  %v395_v18 = vpop.trf.xlu1  ;;  %475 = vxpose.xlu0.b32.cont [5/16] %v133_v17, 128  ;;  %v363_v19 = vpop.trf.xlu0  ;;  %v181_v16 = vld [vmem:[#allocation2 + $0x4f0] sm:$0xff]  ;;  %v180_v17 = vld [vmem:[#allocation2 + $0x4e8] sm:$0xff] }
 0x125   :  { %672 = vst [vmem:[#allocation5 + $0x248] sm:$0xff] %v395_v18  ;;  %640 = vst [vmem:[#allocation5 + $0x148] sm:$0xff] %v363_v19 }
 0x128   :  { %508 = vxpose.xlu1.b32.cont [6/16] %v182_v20, 128  ;;  %v396_v22 = vpop.trf.xlu1  ;;  %476 = vxpose.xlu0.b32.cont [6/16] %v136_v21, 128  ;;  %v364_v23 = vpop.trf.xlu0  ;;  %v184_v20 = vld [vmem:[#allocation2 + $0x508] sm:$0xff]  ;;  %v183_v21 = vld [vmem:[#allocation2 + $0x500] sm:$0xff] }
 0x129   :  { %674 = vst [vmem:[#allocation5 + $0x258] sm:$0xff] %v396_v22  ;;  %642 = vst [vmem:[#allocation5 + $0x158] sm:$0xff] %v364_v23 }
 0x12c   :  { %509 = vxpose.xlu1.b32.cont [7/16] %v185_v24, 128  ;;  %v397_v26 = vpop.trf.xlu1  ;;  %477 = vxpose.xlu0.b32.cont [7/16] %v139_v25, 128  ;;  %v365_v27 = vpop.trf.xlu0  ;;  %v187_v24 = vld [vmem:[#allocation2 + $0x520] sm:$0xff]  ;;  %v186_v25 = vld [vmem:[#allocation2 + $0x518] sm:$0xff] }
 0x12d   :  { %676 = vst [vmem:[#allocation5 + $0x268] sm:$0xff] %v397_v26  ;;  %644 = vst [vmem:[#allocation5 + $0x168] sm:$0xff] %v365_v27 }
 0x130   :  { %510 = vxpose.xlu1.b32.cont [8/16] %v188_v28, 128  ;;  %v398_v30 = vpop.trf.xlu1  ;;  %478 = vxpose.xlu0.b32.cont [8/16] %v142_v29, 128  ;;  %v366_v31 = vpop.trf.xlu0  ;;  %v190_v28 = vld [vmem:[#allocation2 + $0x538] sm:$0xff]  ;;  %v189_v29 = vld [vmem:[#allocation2 + $0x530] sm:$0xff] }
 0x131   :  { %678 = vst [vmem:[#allocation5 + $0x278] sm:$0xff] %v398_v30  ;;  %646 = vst [vmem:[#allocation5 + $0x178] sm:$0xff] %v366_v31 }
 0x134   :  { %511 = vxpose.xlu1.b32.cont [9/16] %v191_v32, 128  ;;  %v399_v34 = vpop.trf.xlu1  ;;  %479 = vxpose.xlu0.b32.cont [9/16] %v145_v33, 128  ;;  %v367_v35 = vpop.trf.xlu0  ;;  %v193_v32 = vld [vmem:[#allocation2 + $0x550] sm:$0xff]  ;;  %v192_v33 = vld [vmem:[#allocation2 + $0x548] sm:$0xff] }
 0x135   :  { %680 = vst [vmem:[#allocation5 + $0x288] sm:$0xff] %v399_v34  ;;  %648 = vst [vmem:[#allocation5 + $0x188] sm:$0xff] %v367_v35 }
 0x138   :  { %512 = vxpose.xlu1.b32.cont [10/16] %v194_v36, 128  ;;  %v400_v38 = vpop.trf.xlu1  ;;  %480 = vxpose.xlu0.b32.cont [10/16] %v148_v37, 128  ;;  %v368_v39 = vpop.trf.xlu0  ;;  %v196_v36 = vld [vmem:[#allocation2 + $0x568] sm:$0xff]  ;;  %v195_v37 = vld [vmem:[#allocation2 + $0x560] sm:$0xff] }
 0x139   :  { %682 = vst [vmem:[#allocation5 + $0x298] sm:$0xff] %v400_v38  ;;  %650 = vst [vmem:[#allocation5 + $0x198] sm:$0xff] %v368_v39 }
 0x13c   :  { %513 = vxpose.xlu1.b32.cont [11/16] %v197_v40, 128  ;;  %v401_v42 = vpop.trf.xlu1  ;;  %481 = vxpose.xlu0.b32.cont [11/16] %v151_v41, 128  ;;  %v369_v43 = vpop.trf.xlu0  ;;  %v199_v40 = vld [vmem:[#allocation2 + $0x580] sm:$0xff]  ;;  %v198_v41 = vld [vmem:[#allocation2 + $0x578] sm:$0xff] }
 0x13d   :  { %684 = vst [vmem:[#allocation5 + $0x2a8] sm:$0xff] %v401_v42  ;;  %652 = vst [vmem:[#allocation5 + $0x1a8] sm:$0xff] %v369_v43 }
 0x140   :  { %514 = vxpose.xlu1.b32.cont [12/16] %v200_v44, 128  ;;  %v402_v46 = vpop.trf.xlu1  ;;  %482 = vxpose.xlu0.b32.cont [12/16] %v154_v45, 128  ;;  %v370_v47 = vpop.trf.xlu0  ;;  %v202_v44 = vld [vmem:[#allocation2 + $0x598] sm:$0xff]  ;;  %v201_v45 = vld [vmem:[#allocation2 + $0x590] sm:$0xff] }
 0x141   :  { %686 = vst [vmem:[#allocation5 + $0x2b8] sm:$0xff] %v402_v46  ;;  %654 = vst [vmem:[#allocation5 + $0x1b8] sm:$0xff] %v370_v47 }
 0x144   :  { %515 = vxpose.xlu1.b32.cont [13/16] %v203_v48, 128  ;;  %v403_v50 = vpop.trf.xlu1  ;;  %483 = vxpose.xlu0.b32.cont [13/16] %v157_v49, 128  ;;  %v371_v51 = vpop.trf.xlu0  ;;  %v205_v48 = vld [vmem:[#allocation2 + $0x5b0] sm:$0xff]  ;;  %v204_v49 = vld [vmem:[#allocation2 + $0x5a8] sm:$0xff] }
 0x145   :  { %688 = vst [vmem:[#allocation5 + $0x2c8] sm:$0xff] %v403_v50  ;;  %656 = vst [vmem:[#allocation5 + $0x1c8] sm:$0xff] %v371_v51 }
 0x148   :  { %516 = vxpose.xlu1.b32.cont [14/16] %v206_v52, 128  ;;  %v404_v54 = vpop.trf.xlu1  ;;  %484 = vxpose.xlu0.b32.cont [14/16] %v160_v53, 128  ;;  %v372_v55 = vpop.trf.xlu0  ;;  %v208_v52 = vld [vmem:[#allocation2 + $0x5c8] sm:$0xff]  ;;  %v207_v53 = vld [vmem:[#allocation2 + $0x5c0] sm:$0xff] }
 0x149   :  { %690 = vst [vmem:[#allocation5 + $0x2d8] sm:$0xff] %v404_v54  ;;  %658 = vst [vmem:[#allocation5 + $0x1d8] sm:$0xff] %v372_v55 }
 0x14c   :  { %517 = vxpose.xlu1.b32.cont [15/16] %v209_v56, 128  ;;  %v405_v58 = vpop.trf.xlu1  ;;  %485 = vxpose.xlu0.b32.cont [15/16] %v163_v57, 128  ;;  %v373_v59 = vpop.trf.xlu0  ;;  %v211_v56 = vld [vmem:[#allocation2 + $0x5e0] sm:$0xff]  ;;  %v210_v57 = vld [vmem:[#allocation2 + $0x5d8] sm:$0xff] }
 0x14d   :  { %692 = vst [vmem:[#allocation5 + $0x2e8] sm:$0xff] %v405_v58  ;;  %660 = vst [vmem:[#allocation5 + $0x1e8] sm:$0xff] %v373_v59 }
 0x150   :  { %518 = vxpose.xlu1.b32.end [16/16] %v212_v60, 128  ;;  %v406_v62 = vpop.trf.xlu1  ;;  %486 = vxpose.xlu0.b32.end [16/16] %v166_v61, 128  ;;  %v374_v63 = vpop.trf.xlu0  ;;  %v214_v60 = vld [vmem:[#allocation2 + $0x5f8] sm:$0xff]  ;;  %v213_v61 = vld [vmem:[#allocation2 + $0x5f0] sm:$0xff] }
 0x151   :  { %694 = vst [vmem:[#allocation5 + $0x2f8] sm:$0xff] %v406_v62  ;;  %662 = vst [vmem:[#allocation5 + $0x1f8] sm:$0xff] %v374_v63 }
 0x154   :  { %567 = vxpose.xlu1.b32.start [1/16] %v169_v0, 128  ;;  %v455_v2 = vpop.trf.xlu1  ;;  %535 = vxpose.xlu0.b32.start [1/16] %v168_v1, 128  ;;  %v423_v3 = vpop.trf.xlu0 }
 0x155   :  { %727 = vst [vmem:[#allocation5 + $0x400] sm:$0xff] %v455_v2  ;;  %695 = vst [vmem:[#allocation5 + $0x300] sm:$0xff] %v423_v3 }
 0x158   :  { %568 = vxpose.xlu1.b32.cont [2/16] %v172_v4, 128  ;;  %v456_v6 = vpop.trf.xlu1  ;;  %536 = vxpose.xlu0.b32.cont [2/16] %v171_v5, 128  ;;  %v424_v7 = vpop.trf.xlu0 }
 0x159   :  { %729 = vst [vmem:[#allocation5 + $0x410] sm:$0xff] %v456_v6  ;;  %697 = vst [vmem:[#allocation5 + $0x310] sm:$0xff] %v424_v7 }
 0x15c   :  { %569 = vxpose.xlu1.b32.cont [3/16] %v175_v8, 128  ;;  %v457_v10 = vpop.trf.xlu1  ;;  %537 = vxpose.xlu0.b32.cont [3/16] %v174_v9, 128  ;;  %v425_v11 = vpop.trf.xlu0 }
 0x15d   :  { %731 = vst [vmem:[#allocation5 + $0x420] sm:$0xff] %v457_v10  ;;  %699 = vst [vmem:[#allocation5 + $0x320] sm:$0xff] %v425_v11 }
 0x160   :  { %570 = vxpose.xlu1.b32.cont [4/16] %v178_v12, 128  ;;  %v458_v14 = vpop.trf.xlu1  ;;  %538 = vxpose.xlu0.b32.cont [4/16] %v177_v13, 128  ;;  %v426_v15 = vpop.trf.xlu0 }
 0x161   :  { %733 = vst [vmem:[#allocation5 + $0x430] sm:$0xff] %v458_v14  ;;  %701 = vst [vmem:[#allocation5 + $0x330] sm:$0xff] %v426_v15 }
 0x164   :  { %571 = vxpose.xlu1.b32.cont [5/16] %v181_v16, 128  ;;  %v459_v18 = vpop.trf.xlu1  ;;  %539 = vxpose.xlu0.b32.cont [5/16] %v180_v17, 128  ;;  %v427_v19 = vpop.trf.xlu0 }
 0x165   :  { %735 = vst [vmem:[#allocation5 + $0x440] sm:$0xff] %v459_v18  ;;  %703 = vst [vmem:[#allocation5 + $0x340] sm:$0xff] %v427_v19 }
 0x168   :  { %572 = vxpose.xlu1.b32.cont [6/16] %v184_v20, 128  ;;  %v460_v22 = vpop.trf.xlu1  ;;  %540 = vxpose.xlu0.b32.cont [6/16] %v183_v21, 128  ;;  %v428_v23 = vpop.trf.xlu0 }
 0x169   :  { %737 = vst [vmem:[#allocation5 + $0x450] sm:$0xff] %v460_v22  ;;  %705 = vst [vmem:[#allocation5 + $0x350] sm:$0xff] %v428_v23 }
 0x16c   :  { %573 = vxpose.xlu1.b32.cont [7/16] %v187_v24, 128  ;;  %v461_v26 = vpop.trf.xlu1  ;;  %541 = vxpose.xlu0.b32.cont [7/16] %v186_v25, 128  ;;  %v429_v27 = vpop.trf.xlu0 }
 0x16d   :  { %739 = vst [vmem:[#allocation5 + $0x460] sm:$0xff] %v461_v26  ;;  %707 = vst [vmem:[#allocation5 + $0x360] sm:$0xff] %v429_v27 }
 0x170   :  { %574 = vxpose.xlu1.b32.cont [8/16] %v190_v28, 128  ;;  %v462_v30 = vpop.trf.xlu1  ;;  %542 = vxpose.xlu0.b32.cont [8/16] %v189_v29, 128  ;;  %v430_v31 = vpop.trf.xlu0 }
 0x171   :  { %741 = vst [vmem:[#allocation5 + $0x470] sm:$0xff] %v462_v30  ;;  %709 = vst [vmem:[#allocation5 + $0x370] sm:$0xff] %v430_v31 }
 0x174   :  { %575 = vxpose.xlu1.b32.cont [9/16] %v193_v32, 128  ;;  %v463_v34 = vpop.trf.xlu1  ;;  %543 = vxpose.xlu0.b32.cont [9/16] %v192_v33, 128  ;;  %v431_v35 = vpop.trf.xlu0 }
 0x175   :  { %743 = vst [vmem:[#allocation5 + $0x480] sm:$0xff] %v463_v34  ;;  %711 = vst [vmem:[#allocation5 + $0x380] sm:$0xff] %v431_v35 }
 0x178   :  { %576 = vxpose.xlu1.b32.cont [10/16] %v196_v36, 128  ;;  %v464_v38 = vpop.trf.xlu1  ;;  %544 = vxpose.xlu0.b32.cont [10/16] %v195_v37, 128  ;;  %v432_v39 = vpop.trf.xlu0 }
 0x179   :  { %745 = vst [vmem:[#allocation5 + $0x490] sm:$0xff] %v464_v38  ;;  %713 = vst [vmem:[#allocation5 + $0x390] sm:$0xff] %v432_v39 }
 0x17c   :  { %577 = vxpose.xlu1.b32.cont [11/16] %v199_v40, 128  ;;  %v465_v42 = vpop.trf.xlu1  ;;  %545 = vxpose.xlu0.b32.cont [11/16] %v198_v41, 128  ;;  %v433_v43 = vpop.trf.xlu0 }
 0x17d   :  { %747 = vst [vmem:[#allocation5 + $0x4a0] sm:$0xff] %v465_v42  ;;  %715 = vst [vmem:[#allocation5 + $0x3a0] sm:$0xff] %v433_v43 }
 0x180   :  { %578 = vxpose.xlu1.b32.cont [12/16] %v202_v44, 128  ;;  %v466_v46 = vpop.trf.xlu1  ;;  %546 = vxpose.xlu0.b32.cont [12/16] %v201_v45, 128  ;;  %v434_v47 = vpop.trf.xlu0 }
 0x181   :  { %749 = vst [vmem:[#allocation5 + $0x4b0] sm:$0xff] %v466_v46  ;;  %717 = vst [vmem:[#allocation5 + $0x3b0] sm:$0xff] %v434_v47 }
 0x184   :  { %579 = vxpose.xlu1.b32.cont [13/16] %v205_v48, 128  ;;  %v467_v50 = vpop.trf.xlu1  ;;  %547 = vxpose.xlu0.b32.cont [13/16] %v204_v49, 128  ;;  %v435_v51 = vpop.trf.xlu0 }
 0x185   :  { %751 = vst [vmem:[#allocation5 + $0x4c0] sm:$0xff] %v467_v50  ;;  %719 = vst [vmem:[#allocation5 + $0x3c0] sm:$0xff] %v435_v51 }
 0x188   :  { %580 = vxpose.xlu1.b32.cont [14/16] %v208_v52, 128  ;;  %v468_v54 = vpop.trf.xlu1  ;;  %548 = vxpose.xlu0.b32.cont [14/16] %v207_v53, 128  ;;  %v436_v55 = vpop.trf.xlu0 }
 0x189   :  { %753 = vst [vmem:[#allocation5 + $0x4d0] sm:$0xff] %v468_v54  ;;  %721 = vst [vmem:[#allocation5 + $0x3d0] sm:$0xff] %v436_v55 }
 0x18c   :  { %581 = vxpose.xlu1.b32.cont [15/16] %v211_v56, 128  ;;  %v469_v58 = vpop.trf.xlu1  ;;  %549 = vxpose.xlu0.b32.cont [15/16] %v210_v57, 128  ;;  %v437_v59 = vpop.trf.xlu0 }
 0x18d   :  { %755 = vst [vmem:[#allocation5 + $0x4e0] sm:$0xff] %v469_v58  ;;  %723 = vst [vmem:[#allocation5 + $0x3e0] sm:$0xff] %v437_v59 }
 0x190   :  { %582 = vxpose.xlu1.b32.end [16/16] %v214_v60, 128  ;;  %v470_v62 = vpop.trf.xlu1  ;;  %550 = vxpose.xlu0.b32.end [16/16] %v213_v61, 128  ;;  %v438_v63 = vpop.trf.xlu0 }
 0x191   :  { %757 = vst [vmem:[#allocation5 + $0x4f0] sm:$0xff] %v470_v62  ;;  %725 = vst [vmem:[#allocation5 + $0x3f0] sm:$0xff] %v438_v63 }
 0x194   :  { %v519_v0 = vpop.trf.xlu1  ;;  %v487_v1 = vpop.trf.xlu0 }
 0x195   :  { %696 = vst [vmem:[#allocation5 + $0x308] sm:$0xff] %v519_v0  ;;  %759 = vst [vmem:[#allocation5 + $0x500] sm:$0xff] %v487_v1 }
 0x198   :  { %v520_v2 = vpop.trf.xlu1  ;;  %v488_v3 = vpop.trf.xlu0 }
 0x199   :  { %698 = vst [vmem:[#allocation5 + $0x318] sm:$0xff] %v520_v2  ;;  %761 = vst [vmem:[#allocation5 + $0x510] sm:$0xff] %v488_v3 }
 0x19c   :  { %v521_v4 = vpop.trf.xlu1  ;;  %v489_v5 = vpop.trf.xlu0 }
 0x19d   :  { %700 = vst [vmem:[#allocation5 + $0x328] sm:$0xff] %v521_v4  ;;  %763 = vst [vmem:[#allocation5 + $0x520] sm:$0xff] %v489_v5 }
 0x1a0   :  { %v522_v6 = vpop.trf.xlu1  ;;  %v490_v7 = vpop.trf.xlu0 }
 0x1a1   :  { %702 = vst [vmem:[#allocation5 + $0x338] sm:$0xff] %v522_v6  ;;  %765 = vst [vmem:[#allocation5 + $0x530] sm:$0xff] %v490_v7 }
 0x1a4   :  { %v523_v8 = vpop.trf.xlu1  ;;  %v491_v9 = vpop.trf.xlu0 }
 0x1a5   :  { %704 = vst [vmem:[#allocation5 + $0x348] sm:$0xff] %v523_v8  ;;  %767 = vst [vmem:[#allocation5 + $0x540] sm:$0xff] %v491_v9 }
 0x1a8   :  { %v524_v10 = vpop.trf.xlu1  ;;  %v492_v11 = vpop.trf.xlu0 }
 0x1a9   :  { %706 = vst [vmem:[#allocation5 + $0x358] sm:$0xff] %v524_v10  ;;  %769 = vst [vmem:[#allocation5 + $0x550] sm:$0xff] %v492_v11 }
 0x1ac   :  { %v525_v12 = vpop.trf.xlu1  ;;  %v493_v13 = vpop.trf.xlu0 }
 0x1ad   :  { %708 = vst [vmem:[#allocation5 + $0x368] sm:$0xff] %v525_v12  ;;  %771 = vst [vmem:[#allocation5 + $0x560] sm:$0xff] %v493_v13 }
 0x1b0   :  { %v526_v14 = vpop.trf.xlu1  ;;  %v494_v15 = vpop.trf.xlu0 }
 0x1b1   :  { %710 = vst [vmem:[#allocation5 + $0x378] sm:$0xff] %v526_v14  ;;  %773 = vst [vmem:[#allocation5 + $0x570] sm:$0xff] %v494_v15 }
 0x1b4   :  { %v527_v16 = vpop.trf.xlu1  ;;  %v495_v17 = vpop.trf.xlu0 }
 0x1b5   :  { %712 = vst [vmem:[#allocation5 + $0x388] sm:$0xff] %v527_v16  ;;  %775 = vst [vmem:[#allocation5 + $0x580] sm:$0xff] %v495_v17 }
 0x1b8   :  { %v528_v18 = vpop.trf.xlu1  ;;  %v496_v19 = vpop.trf.xlu0 }
 0x1b9   :  { %714 = vst [vmem:[#allocation5 + $0x398] sm:$0xff] %v528_v18  ;;  %777 = vst [vmem:[#allocation5 + $0x590] sm:$0xff] %v496_v19 }
 0x1bc   :  { %v529_v20 = vpop.trf.xlu1  ;;  %v497_v21 = vpop.trf.xlu0 }
 0x1bd   :  { %716 = vst [vmem:[#allocation5 + $0x3a8] sm:$0xff] %v529_v20  ;;  %779 = vst [vmem:[#allocation5 + $0x5a0] sm:$0xff] %v497_v21 }
 0x1c0   :  { %v530_v22 = vpop.trf.xlu1  ;;  %v498_v23 = vpop.trf.xlu0 }
 0x1c1   :  { %718 = vst [vmem:[#allocation5 + $0x3b8] sm:$0xff] %v530_v22  ;;  %781 = vst [vmem:[#allocation5 + $0x5b0] sm:$0xff] %v498_v23 }
 0x1c4   :  { %v531_v24 = vpop.trf.xlu1  ;;  %v499_v25 = vpop.trf.xlu0 }
 0x1c5   :  { %720 = vst [vmem:[#allocation5 + $0x3c8] sm:$0xff] %v531_v24  ;;  %783 = vst [vmem:[#allocation5 + $0x5c0] sm:$0xff] %v499_v25 }
 0x1c8   :  { %v532_v26 = vpop.trf.xlu1  ;;  %v500_v27 = vpop.trf.xlu0 }
 0x1c9   :  { %722 = vst [vmem:[#allocation5 + $0x3d8] sm:$0xff] %v532_v26  ;;  %785 = vst [vmem:[#allocation5 + $0x5d0] sm:$0xff] %v500_v27 }
 0x1cc   :  { %v533_v28 = vpop.trf.xlu1  ;;  %v501_v29 = vpop.trf.xlu0 }
 0x1cd   :  { %724 = vst [vmem:[#allocation5 + $0x3e8] sm:$0xff] %v533_v28  ;;  %787 = vst [vmem:[#allocation5 + $0x5e0] sm:$0xff] %v501_v29 }
 0x1d0   :  { %v534_v30 = vpop.trf.xlu1  ;;  %v502_v31 = vpop.trf.xlu0 }
 0x1d1   :  { %726 = vst [vmem:[#allocation5 + $0x3f8] sm:$0xff] %v534_v30  ;;  %789 = vst [vmem:[#allocation5 + $0x5f0] sm:$0xff] %v502_v31 }
 0x1d4   :  { %v583_v32 = vpop.trf.xlu1  ;;  %v551_v33 = vpop.trf.xlu0 }
 0x1d5   :  { %760 = vst [vmem:[#allocation5 + $0x508] sm:$0xff] %v583_v32  ;;  %728 = vst [vmem:[#allocation5 + $0x408] sm:$0xff] %v551_v33 }
 0x1d8   :  { %v584_v34 = vpop.trf.xlu1  ;;  %v552_v35 = vpop.trf.xlu0 }
 0x1d9   :  { %762 = vst [vmem:[#allocation5 + $0x518] sm:$0xff] %v584_v34  ;;  %730 = vst [vmem:[#allocation5 + $0x418] sm:$0xff] %v552_v35 }
 0x1dc   :  { %v585_v36 = vpop.trf.xlu1  ;;  %v553_v37 = vpop.trf.xlu0 }
 0x1dd   :  { %764 = vst [vmem:[#allocation5 + $0x528] sm:$0xff] %v585_v36  ;;  %732 = vst [vmem:[#allocation5 + $0x428] sm:$0xff] %v553_v37 }
 0x1e0   :  { %v586_v38 = vpop.trf.xlu1  ;;  %v554_v39 = vpop.trf.xlu0 }
 0x1e1   :  { %766 = vst [vmem:[#allocation5 + $0x538] sm:$0xff] %v586_v38  ;;  %734 = vst [vmem:[#allocation5 + $0x438] sm:$0xff] %v554_v39 }
 0x1e4   :  { %v587_v40 = vpop.trf.xlu1  ;;  %v555_v41 = vpop.trf.xlu0 }
 0x1e5   :  { %768 = vst [vmem:[#allocation5 + $0x548] sm:$0xff] %v587_v40  ;;  %736 = vst [vmem:[#allocation5 + $0x448] sm:$0xff] %v555_v41 }
 0x1e8   :  { %v588_v42 = vpop.trf.xlu1  ;;  %v556_v43 = vpop.trf.xlu0 }
 0x1e9   :  { %770 = vst [vmem:[#allocation5 + $0x558] sm:$0xff] %v588_v42  ;;  %738 = vst [vmem:[#allocation5 + $0x458] sm:$0xff] %v556_v43 }
 0x1ec   :  { %v589_v44 = vpop.trf.xlu1  ;;  %v557_v45 = vpop.trf.xlu0 }
 0x1ed   :  { %772 = vst [vmem:[#allocation5 + $0x568] sm:$0xff] %v589_v44  ;;  %740 = vst [vmem:[#allocation5 + $0x468] sm:$0xff] %v557_v45 }
 0x1f0   :  { %v590_v46 = vpop.trf.xlu1  ;;  %v558_v47 = vpop.trf.xlu0 }
 0x1f1   :  { %774 = vst [vmem:[#allocation5 + $0x578] sm:$0xff] %v590_v46  ;;  %742 = vst [vmem:[#allocation5 + $0x478] sm:$0xff] %v558_v47 }
 0x1f4   :  { %v591_v48 = vpop.trf.xlu1  ;;  %v559_v49 = vpop.trf.xlu0 }
 0x1f5   :  { %776 = vst [vmem:[#allocation5 + $0x588] sm:$0xff] %v591_v48  ;;  %744 = vst [vmem:[#allocation5 + $0x488] sm:$0xff] %v559_v49 }
 0x1f8   :  { %v592_v50 = vpop.trf.xlu1  ;;  %v560_v51 = vpop.trf.xlu0 }
 0x1f9   :  { %778 = vst [vmem:[#allocation5 + $0x598] sm:$0xff] %v592_v50  ;;  %746 = vst [vmem:[#allocation5 + $0x498] sm:$0xff] %v560_v51 }
 0x1fc   :  { %v593_v52 = vpop.trf.xlu1  ;;  %v561_v53 = vpop.trf.xlu0 }
 0x1fd   :  { %780 = vst [vmem:[#allocation5 + $0x5a8] sm:$0xff] %v593_v52  ;;  %748 = vst [vmem:[#allocation5 + $0x4a8] sm:$0xff] %v561_v53 }
 0x200   :  { %v594_v54 = vpop.trf.xlu1  ;;  %v562_v55 = vpop.trf.xlu0 }
 0x201   :  { %782 = vst [vmem:[#allocation5 + $0x5b8] sm:$0xff] %v594_v54  ;;  %750 = vst [vmem:[#allocation5 + $0x4b8] sm:$0xff] %v562_v55 }
 0x204   :  { %v595_v56 = vpop.trf.xlu1  ;;  %v563_v57 = vpop.trf.xlu0 }
 0x205   :  { %784 = vst [vmem:[#allocation5 + $0x5c8] sm:$0xff] %v595_v56  ;;  %752 = vst [vmem:[#allocation5 + $0x4c8] sm:$0xff] %v563_v57 }
 0x208   :  { %v596_v58 = vpop.trf.xlu1  ;;  %v564_v59 = vpop.trf.xlu0 }
 0x209   :  { %786 = vst [vmem:[#allocation5 + $0x5d8] sm:$0xff] %v596_v58  ;;  %754 = vst [vmem:[#allocation5 + $0x4d8] sm:$0xff] %v564_v59 }
 0x20c   :  { %v597_v60 = vpop.trf.xlu1  ;;  %v565_v61 = vpop.trf.xlu0 }
 0x20d   :  { %788 = vst [vmem:[#allocation5 + $0x5e8] sm:$0xff] %v597_v60  ;;  %756 = vst [vmem:[#allocation5 + $0x4e8] sm:$0xff] %v565_v61 }
 0x210   :  { %v598_v62 = vpop.trf.xlu1  ;;  %v566_v63 = vpop.trf.xlu0 }
 0x211   :  { %790 = vst [vmem:[#allocation5 + $0x5f8] sm:$0xff] %v598_v62  ;;  %758 = vst [vmem:[#allocation5 + $0x4f8] sm:$0xff] %v566_v63 }
 0x212   :  { %847 = shalt.err (!%p844_p12)
}
 0x213   :  { %s848_s24 = scalar_lea.hbm %s903_s1, 24576 }
 0x214   :  { %p849_p13 = scmp.ne.s32.totalorder %s903_s1, %s848_s24  ;;  %p852_p0 = scmp.lt.u32.totalorder %s848_s24, %s903_s1 }
 0x216   :  { %p854_p1 = pnand %p852_p0, %p849_p13 }
 0x218   :  { %857 = shalt.err (!%p854_p1)
}
 0x219   :  { %s866_s29 = smov 256   ;;  %s867_s30 = smov 16  }
 0x21a   :  { %802 = dma.vmem_to_hbm [thread:$0]  %s797_s20, 24576, %s903_s1, [#allocation4], %s866_s29, %s866_s29, %s867_s30  }
 0x21b   :  { %860 = dma.done.wait [#allocation4], 24576  }
 0x21c   :  { %861 = vsyncadd [#allocation4], 4294942720 }
 0x21d   :  { %806 = vsyncpa [#allocation3], 1 }
 0x21e   :  { %807 = vsyncpa [#allocation4], 1 }

</bundles_post_ra>
